<compile_context>
chip_gen: v7x
topology: tpu7x:2x2x1
jax: 0.10.0
libtpu: 0.0.40
codegen_flags: <defaults>
</compile_context>

<pallas_src>
import functools
import math

import jax
import jax.numpy as jnp
from jax.experimental import pallas as pl
from jax.experimental.pallas import tpu as pltpu


# ----------------------------------------------------------------------------
# Kernel 1: one (direction, time-chunk) grid step of the recurrence.
# Grid = (2, nT): axis 0 = direction (parallel -> v7x dual TensorCore),
# axis 1 = time chunks (arbitrary; h/c carried in VMEM scratch).
# The streamed input is the already-projected pre-activation x@Wx+b, so the
# per-step work is one h@Wh MXU dot + gate activations.
# ----------------------------------------------------------------------------
def _bilstm_dir_kernel(xp_ref, wh_ref, hout_ref, h_sc, c_sc, *, unroll):
    T_blk, Bp, G = xp_ref.shape
    H = G // 4

    @pl.when(pl.program_id(1) == 0)                 # init state per direction
    def _():
        h_sc[...] = jnp.zeros_like(h_sc)
        c_sc[...] = jnp.zeros_like(c_sc)

    wh = wh_ref[...]                                # (H, 4H); constant over i

    def step(t, carry):
        h, c = carry
        pre = xp_ref[t].astype(jnp.float32) + jnp.dot(
            h.astype(wh.dtype), wh, preferred_element_type=jnp.float32)
        # fused gate order [g | i | f | o]
        g = jnp.tanh(pre[:, :H])
        s = jax.nn.sigmoid(pre[:, H:])              # single EUP slab: i, f, o
        c = g * s[:, :H] + c * s[:, H:2 * H]
        h = jnp.tanh(c) * s[:, 2 * H:]
        return h, c

    h, c = jax.lax.fori_loop(0, T_blk, step, (h_sc[...], c_sc[...]),
                             unroll=min(unroll, T_blk))
    h_sc[...] = h
    c_sc[...] = c
    hout_ref[...] = h                               # resident block across i


# ----------------------------------------------------------------------------
# Kernel 2: output head (needs both directions, so it lives outside the
# direction-parallel recurrence). Split dot (no concat), masked log_softmax,
# lane-dense (Bp, Cp) store.
# ----------------------------------------------------------------------------
def _head_kernel(h_ref, wphf_ref, wphb_ref, bp_ref, y_ref, *, num_classes):
    hf = h_ref[0].astype(wphf_ref.dtype)
    hb = h_ref[1].astype(wphb_ref.dtype)
    p = (jnp.dot(hf, wphf_ref[...], preferred_element_type=jnp.float32)
         + jnp.dot(hb, wphb_ref[...], preferred_element_type=jnp.float32)
         + bp_ref[...])                             # bp stays f32
    col = jax.lax.broadcasted_iota(jnp.int32, p.shape, 1)
    p = jnp.where(col < num_classes, p, -1e30)      # mask padded class lanes
    m = jnp.max(p, axis=-1, keepdims=True)
    lse = jnp.log(jnp.sum(jnp.exp(p - m), axis=-1, keepdims=True)) + m
    y_ref[...] = p - lse


# ----------------------------------------------------------------------------
# Parameter construction (deterministic, mirrors the PyTorch __init__).
# ----------------------------------------------------------------------------
def kaiming_normal(key, d1, d2, nonlin):
    gain = 1.0 if nonlin == 'linear' else 5.0 / 3.0      # 'tanh'
    std = gain / math.sqrt(d2)                           # fan_in = dim_2
    return std * jax.random.normal(key, (d1, d2), jnp.float32)


def make_lstm_cell_params(key, input_dim, hidden_dim):
    ks = jax.random.split(key, 8)
    W_gx = kaiming_normal(ks[0], hidden_dim, input_dim, 'linear')
    W_ix = kaiming_normal(ks[1], hidden_dim, input_dim, 'linear')
    W_fx = kaiming_normal(ks[2], hidden_dim, input_dim, 'linear')
    W_ox = kaiming_normal(ks[3], hidden_dim, input_dim, 'linear')
    W_gh = kaiming_normal(ks[4], hidden_dim, hidden_dim, 'tanh')
    W_ih = kaiming_normal(ks[5], hidden_dim, hidden_dim, 'tanh')
    W_fh = kaiming_normal(ks[6], hidden_dim, hidden_dim, 'tanh')
    W_oh = kaiming_normal(ks[7], hidden_dim, hidden_dim, 'tanh')
    # Fused layout for pre = x @ Wx + h @ Wh + b, gate order [g | i | f | o].
    wx = jnp.concatenate([W_gx.T, W_ix.T, W_fx.T, W_ox.T], axis=1)   # (E, 4H)
    wh = jnp.concatenate([W_gh.T, W_ih.T, W_fh.T, W_oh.T], axis=1)   # (H, 4H)
    b = jnp.zeros((1, 4 * hidden_dim), jnp.float32)   # independent zero biases
    return wx, wh, b


def make_bilstm_params(key, hidden_dim, num_classes):
    embed_dim = hidden_dim // 2
    k_emb, k_fwd, k_bwd, k_ph = jax.random.split(key, 4)
    return {
        'embedding': jax.random.normal(k_emb, (num_classes, embed_dim),
                                       jnp.float32),    # nn.Embedding ~ N(0,1)
        'fwd': make_lstm_cell_params(k_fwd, embed_dim, hidden_dim),
        'bwd': make_lstm_cell_params(k_bwd, embed_dim, hidden_dim),
        'W_ph': kaiming_normal(k_ph, num_classes, 2 * hidden_dim, 'tanh'),
        'b_p': jnp.zeros((num_classes, 1), jnp.float32),
    }


# ----------------------------------------------------------------------------
# Wrapper: embedding fold / padding / budget sizing in JAX, recurrence + head
# in Pallas.
# ----------------------------------------------------------------------------
def _round_up(n, m):
    return -(-n // m) * m


def _vmem_capacity_bytes():
    """Per-core VMEM capacity; conservative 64 MiB fallback (safe on v7x)."""
    try:
        info = pltpu.get_tpu_info()
        for name in ("vmem_capacity_bytes", "vmem_bytes", "vmem_size_bytes"):
            cap = getattr(info, name, None)
            if cap:
                return int(min(max(int(cap), 32 << 20), 256 << 20))
    except Exception:
        pass
    return 64 << 20


def bilstm_forward(tokens, params, *, t_chunk=None,
                   compute_dtype=jnp.bfloat16, unroll=4):
    """Forward pass of the PyTorch biLSTM. Returns (B, C) log-probabilities.

    compute_dtype=bf16 streams pre-activations / weights in bf16 (v6e/v7x MXU
    rate, half the HBM/VMEM); accumulation and h/c state stay f32.
    TODO(synk): validate bf16 drift vs f32 at realistic T before relying on it.
    """
    B, T = tokens.shape
    emb = params['embedding']                           # (C, E)
    C, E = emb.shape
    wx_f, wh_f, b_f = params['fwd']
    wx_b, wh_b, b_b = params['bwd']
    H = wh_f.shape[0]
    G = 4 * H

    Bp = _round_up(max(B, 8), 8)                        # sublane-aligned batch
    Cp = _round_up(C, 128)                              # lane-dense class dim

    # ---- fold the input projection into the embedding table (lane-dense) ----
    # pre_x[token] = emb[token] @ Wx + b == (emb @ Wx + b)[token]
    with jax.default_matmul_precision("highest"):
        table_f = emb @ wx_f + b_f                      # (C, 4H)
        table_b = emb @ wx_b + b_b                      # (C, 4H)
    xp_f = jnp.transpose(table_f[tokens], (1, 0, 2))           # (T, B, 4H)
    xp_b = jnp.transpose(table_b[tokens], (1, 0, 2))[::-1]     # reversed time
    xp = jnp.stack([xp_f, xp_b], axis=0)                       # (2, T, B, 4H)
    if Bp != B:
        xp = jnp.pad(xp, ((0, 0), (0, 0), (0, Bp - B), (0, 0)))
    xp = xp.astype(compute_dtype)

    wh = jnp.stack([wh_f, wh_b], axis=0).astype(compute_dtype)  # (2, H, 4H)

    # ---- generation-aware VMEM budget and t_chunk selection ----
    itemsize = jnp.dtype(compute_dtype).itemsize
    cap = _vmem_capacity_bytes()
    budget = (cap * 3) // 4       # ~96 MiB on v5e/v6e (128 MiB), ~48 MiB on v7x

    g_lane = _round_up(G, 128)
    h_lane = _round_up(H, 128)

    def vmem_estimate(tc):
        return (2 * tc * Bp * g_lane * itemsize             # 2x-buffered xp chunk
                + 2 * _round_up(H, 8) * g_lane * itemsize   # 2x-buffered Wh block
                + 2 * Bp * h_lane * 4                       # 2x-buffered h-out block
                + 2 * Bp * h_lane * 4)                      # h / c scratch (f32)

    divisors = [d for d in range(1, T + 1) if T % d == 0]
    fitting = [d for d in divisors if vmem_estimate(d) <= budget]
    # Largest chunk that fits the budget (amortizes ~0.35us per grid step).
    # TODO(synk): ragged last chunk (pl.when masking) for prime T / tight budgets.
    auto_chunk = fitting[-1] if fitting else 1
    if t_chunk is None:
        t_chunk = auto_chunk
    else:
        t_chunk = max(d for d in divisors
                      if d <= max(min(int(t_chunk), auto_chunk), 1))
    nT = T // t_chunk

    vmem_limit = int(min(max(budget, vmem_estimate(t_chunk) + (2 << 20)),
                         cap - (2 << 20)))

    # ---- recurrence: grid (direction, time-chunk) ----
    h_final = pl.pallas_call(
        functools.partial(_bilstm_dir_kernel, unroll=unroll),
        out_shape=jax.ShapeDtypeStruct((2, Bp, H), jnp.float32),
        grid_spec=pltpu.PrefetchScalarGridSpec(
            num_scalar_prefetch=0,
            grid=(2, nT),
            in_specs=[
                # pipeline_mode=pl.Buffered(3) here if profiling shows exposed
                # DMA at large H / bf16; Wh could use Buffered(1) on v7x.
                pl.BlockSpec((None, t_chunk, Bp, G), lambda d, i: (d, i, 0, 0)),
                pl.BlockSpec((None, H, G), lambda d, i: (d, 0, 0)),
            ],
            out_specs=pl.BlockSpec((None, Bp, H), lambda d, i: (d, 0, 0)),
            scratch_shapes=[pltpu.VMEM((Bp, H), jnp.float32),   # h state
                            pltpu.VMEM((Bp, H), jnp.float32)],  # c state
        ),
        compiler_params=pltpu.CompilerParams(
            # direction axis parallel -> fwd/bwd on v7x's two TensorCores;
            # time-chunk axis carries the recurrence -> arbitrary.
            dimension_semantics=("parallel", "arbitrary"),
            vmem_limit_bytes=vmem_limit,
        ),
    )(xp, wh)

    # ---- head: split dot (no concat) + masked log_softmax ----
    wph_t = params['W_ph'].T                            # (2H, C)
    wph_f = jnp.pad(wph_t[:H], ((0, 0), (0, Cp - C))).astype(compute_dtype)
    wph_b = jnp.pad(wph_t[H:], ((0, 0), (0, Cp - C))).astype(compute_dtype)
    bp = jnp.pad(params['b_p'].T, ((0, 0), (0, Cp - C)))    # (1, Cp), kept f32

    y = pl.pallas_call(
        functools.partial(_head_kernel, num_classes=C),
        out_shape=jax.ShapeDtypeStruct((Bp, Cp), jnp.float32),
        grid_spec=pltpu.PrefetchScalarGridSpec(
            num_scalar_prefetch=0,
            grid=(1,),
            in_specs=[pl.BlockSpec((2, Bp, H), lambda i: (0, 0, 0)),
                      pl.BlockSpec((H, Cp), lambda i: (0, 0)),
                      pl.BlockSpec((H, Cp), lambda i: (0, 0)),
                      pl.BlockSpec((1, Cp), lambda i: (0, 0))],
            out_specs=pl.BlockSpec((Bp, Cp), lambda i: (0, 0)),
        ),
    )(h_final, wph_f, wph_b, bp)

    return y[:B, :C]


# ----------------------------------------------------------------------------
# Pure-JAX reference of the same forward pass (sanity cross-check).
# ----------------------------------------------------------------------------
def bilstm_reference(tokens, params):
    emb = params['embedding']
    x = emb[tokens]                                     # (B, T, E)
    B, T, _ = x.shape
    wx_f, wh_f, b_f = params['fwd']
    wx_b, wh_b, b_b = params['bwd']
    H = wh_f.shape[0]

    def run(xs, wx, wh, b):
        h = jnp.zeros((B, H), jnp.float32)
        c = jnp.zeros((B, H), jnp.float32)
        for t in range(T):
            pre = xs[:, t, :] @ wx + h @ wh + b
            g = jnp.tanh(pre[:, :H])
            i = jax.nn.sigmoid(pre[:, H:2 * H])
            f = jax.nn.sigmoid(pre[:, 2 * H:3 * H])
            o = jax.nn.sigmoid(pre[:, 3 * H:])
            c = g * i + c * f
            h = jnp.tanh(c) * o
        return h

    with jax.default_matmul_precision("highest"):
        h_t = run(x, wx_f, wh_f, b_f)
        h_0 = run(x[:, ::-1, :], wx_b, wh_b, b_b)
        p = jnp.concatenate([h_t, h_0], axis=-1) @ params['W_ph'].T + params['b_p'].T
    return jax.nn.log_softmax(p, axis=-1)


# ----------------------------------------------------------------------------
if __name__ == "__main__":
    key = jax.random.PRNGKey(0)
    batch_size, seq_length, hidden_dim, num_classes = 2, 8, 32, 10

    k_params, k_tokens = jax.random.split(key)
    params = make_bilstm_params(k_params, hidden_dim, num_classes)
    tokens = jax.random.randint(k_tokens, (batch_size, seq_length),
                                0, num_classes, dtype=jnp.int32)

    # f32 path, forced multi-chunk (nT=2) to exercise the streaming carry.
    y = bilstm_forward(tokens, params, t_chunk=4, compute_dtype=jnp.float32)
    y = jax.block_until_ready(y)
    assert y.shape == (batch_size, num_classes)
    row_sums = jnp.sum(jnp.exp(y), axis=-1)
    assert bool(jnp.all(jnp.abs(row_sums - 1.0) < 1e-4))
    y_ref = bilstm_reference(tokens, params)
    assert bool(jnp.max(jnp.abs(y - y_ref)) < 1e-2)

    # f32 path, auto (VMEM-budget-derived) chunking: single chunk here.
    y_auto = jax.block_until_ready(
        bilstm_forward(tokens, params, compute_dtype=jnp.float32))
    assert bool(jnp.max(jnp.abs(y_auto - y_ref)) < 1e-2)

    # Default bf16 compute path (v6e/v7x MXU rate): check it runs and is finite.
    y_bf16 = jax.block_until_ready(bilstm_forward(tokens, params))
    assert y_bf16.shape == (batch_size, num_classes)
    assert bool(jnp.all(jnp.isfinite(y_bf16)))

    print("KERNEL_OK")
</pallas_src>

<mosaic_0001>
module attributes {stable_mosaic.version = 11 : i64} {
  func.func @_bilstm_dir_kernel(%arg0: i32, %arg1: i32, %arg2: memref<1x4x8x128xf32, #tpu.memory_space<vmem>>, %arg3: memref<1x32x128xf32, #tpu.memory_space<vmem>>, %arg4: memref<1x8x32xf32, #tpu.memory_space<vmem>>, %arg5: memref<8x32xf32, #tpu.memory_space<vmem>>, %arg6: memref<8x32xf32, #tpu.memory_space<vmem>>) attributes {dimension_semantics = [#tpu.dimension_semantics<parallel>, #tpu.dimension_semantics<arbitrary>], iteration_bounds = array<i64: 2, 2>, scalar_prefetch = 0 : i64, scratch_operands = 2 : i64, tpu.core_type = #tpu.core_type<tc>, window_params = [{transform_indices = @transform_0, window_bounds = array<i64: 1, 4, 8, 128>}, {transform_indices = @transform_1, window_bounds = array<i64: 1, 32, 128>}, {transform_indices = @transform_2, window_bounds = array<i64: 1, 8, 32>}]} {
    %c0_i32 = arith.constant 0 : i32
    %0 = arith.cmpi eq, %arg1, %c0_i32 : i32
    %1 = arith.extui %0 : i1 to i32
    %c0_i32_0 = arith.constant 0 : i32
    %2 = arith.cmpi ne, %1, %c0_i32_0 : i32
    scf.if %2 {
      %cst_34 = arith.constant 0.000000e+00 : f32
      %96 = vector.broadcast %cst_34 : f32 to vector<8x32xf32>
      %c0_35 = arith.constant 0 : index
      %c0_36 = arith.constant 0 : index
      %97 = vector.load %arg5[%c0_35, %c0_36] : memref<8x32xf32, #tpu.memory_space<vmem>>, vector<8x32xf32>
      tpu.vector_store %arg5[%c0_35, %c0_36], %96 {strides = array<i32>} : memref<8x32xf32, #tpu.memory_space<vmem>>, vector<8x32xf32>,
      %cst_37 = arith.constant 0.000000e+00 : f32
      %98 = vector.broadcast %cst_37 : f32 to vector<8x32xf32>
      %c0_38 = arith.constant 0 : index
      %c0_39 = arith.constant 0 : index
      %99 = vector.load %arg6[%c0_38, %c0_39] : memref<8x32xf32, #tpu.memory_space<vmem>>, vector<8x32xf32>
      tpu.vector_store %arg6[%c0_38, %c0_39], %98 {strides = array<i32>} : memref<8x32xf32, #tpu.memory_space<vmem>>, vector<8x32xf32>,
    } else {
    }
    %c0 = arith.constant 0 : index
    %c0_1 = arith.constant 0 : index
    %c0_2 = arith.constant 0 : index
    %3 = vector.load %arg3[%c0, %c0_1, %c0_2] : memref<1x32x128xf32, #tpu.memory_space<vmem>>, vector<1x32x128xf32>
    %4 = vector.shape_cast %3 : vector<1x32x128xf32> to vector<32x128xf32>
    %c0_3 = arith.constant 0 : index
    %c0_4 = arith.constant 0 : index
    %5 = vector.load %arg5[%c0_3, %c0_4] : memref<8x32xf32, #tpu.memory_space<vmem>>, vector<8x32xf32>
    %c0_5 = arith.constant 0 : index
    %c0_6 = arith.constant 0 : index
    %6 = vector.load %arg6[%c0_5, %c0_6] : memref<8x32xf32, #tpu.memory_space<vmem>>, vector<8x32xf32>
    %c0_i32_7 = arith.constant 0 : i32
    %c0_8 = arith.constant 0 : index
    %7 = arith.index_cast %c0_i32_7 : i32 to index
    %c0_9 = arith.constant 0 : index
    %c0_10 = arith.constant 0 : index
    %8 = vector.load %arg2[%c0_8, %7, %c0_9, %c0_10] : memref<1x4x8x128xf32, #tpu.memory_space<vmem>>, vector<1x1x8x128xf32>
    %9 = vector.shape_cast %8 : vector<1x1x8x128xf32> to vector<8x128xf32>
    %cst = arith.constant dense<0.000000e+00> : vector<8x128xf32>
    %10 = tpu.matmul %5, %4, %cst {dimension_numbers = #tpu.dot_dimension_numbers<[1], [0], [0], [1], [0, 0, 1, 1], [], []>} : vector<8x32xf32>, vector<32x128xf32>, vector<8x128xf32> -> vector<8x128xf32>
    %11 = arith.addf %9, %10 : vector<8x128xf32>
    %12 = vector.extract_strided_slice %11 {offsets = [0, 0], sizes = [8, 32], strides = [1, 1]} : vector<8x128xf32> to vector<8x32xf32>
    %13 = math.tanh %12 : vector<8x32xf32>
    %14 = vector.extract_strided_slice %11 {offsets = [0, 32], sizes = [8, 96], strides = [1, 1]} : vector<8x128xf32> to vector<8x96xf32>
    %15 = arith.negf %14 : vector<8x96xf32>
    %16 = math.exp %15 : vector<8x96xf32>
    %cst_11 = arith.constant 1.000000e+00 : f32
    %17 = vector.broadcast %cst_11 : f32 to vector<8x96xf32>
    %18 = arith.addf %17, %16 : vector<8x96xf32>
    %19 = arith.divf %17, %18 : vector<8x96xf32>
    %20 = vector.extract_strided_slice %19 {offsets = [0, 0], sizes = [8, 32], strides = [1, 1]} : vector<8x96xf32> to vector<8x32xf32>
    %21 = arith.mulf %13, %20 : vector<8x32xf32>
    %22 = vector.extract_strided_slice %19 {offsets = [0, 32], sizes = [8, 32], strides = [1, 1]} : vector<8x96xf32> to vector<8x32xf32>
    %23 = arith.mulf %6, %22 : vector<8x32xf32>
    %24 = arith.addf %21, %23 : vector<8x32xf32>
    %25 = math.tanh %24 : vector<8x32xf32>
    %26 = vector.extract_strided_slice %19 {offsets = [0, 64], sizes = [8, 32], strides = [1, 1]} : vector<8x96xf32> to vector<8x32xf32>
    %27 = arith.mulf %25, %26 : vector<8x32xf32>
    %c1_i32 = arith.constant 1 : i32
    %c0_12 = arith.constant 0 : index
    %28 = arith.index_cast %c1_i32 : i32 to index
    %c0_13 = arith.constant 0 : index
    %c0_14 = arith.constant 0 : index
    %29 = vector.load %arg2[%c0_12, %28, %c0_13, %c0_14] : memref<1x4x8x128xf32, #tpu.memory_space<vmem>>, vector<1x1x8x128xf32>
    %30 = vector.shape_cast %29 : vector<1x1x8x128xf32> to vector<8x128xf32>
    %cst_15 = arith.constant dense<0.000000e+00> : vector<8x128xf32>
    %31 = tpu.matmul %27, %4, %cst_15 {dimension_numbers = #tpu.dot_dimension_numbers<[1], [0], [0], [1], [0, 0, 1, 1], [], []>} : vector<8x32xf32>, vector<32x128xf32>, vector<8x128xf32> -> vector<8x128xf32>
    %32 = arith.addf %30, %31 : vector<8x128xf32>
    %33 = vector.extract_strided_slice %32 {offsets = [0, 0], sizes = [8, 32], strides = [1, 1]} : vector<8x128xf32> to vector<8x32xf32>
    %34 = math.tanh %33 : vector<8x32xf32>
    %35 = vector.extract_strided_slice %32 {offsets = [0, 32], sizes = [8, 96], strides = [1, 1]} : vector<8x128xf32> to vector<8x96xf32>
    %36 = arith.negf %35 : vector<8x96xf32>
    %37 = math.exp %36 : vector<8x96xf32>
    %cst_16 = arith.constant 1.000000e+00 : f32
    %38 = vector.broadcast %cst_16 : f32 to vector<8x96xf32>
    %39 = arith.addf %38, %37 : vector<8x96xf32>
    %40 = arith.divf %38, %39 : vector<8x96xf32>
    %41 = vector.extract_strided_slice %40 {offsets = [0, 0], sizes = [8, 32], strides = [1, 1]} : vector<8x96xf32> to vector<8x32xf32>
    %42 = arith.mulf %34, %41 : vector<8x32xf32>
    %43 = vector.extract_strided_slice %40 {offsets = [0, 32], sizes = [8, 32], strides = [1, 1]} : vector<8x96xf32> to vector<8x32xf32>
    %44 = arith.mulf %24, %43 : vector<8x32xf32>
    %45 = arith.addf %42, %44 : vector<8x32xf32>
    %46 = math.tanh %45 : vector<8x32xf32>
    %47 = vector.extract_strided_slice %40 {offsets = [0, 64], sizes = [8, 32], strides = [1, 1]} : vector<8x96xf32> to vector<8x32xf32>
    %48 = arith.mulf %46, %47 : vector<8x32xf32>
    %c2_i32 = arith.constant 2 : i32
    %c0_17 = arith.constant 0 : index
    %49 = arith.index_cast %c2_i32 : i32 to index
    %c0_18 = arith.constant 0 : index
    %c0_19 = arith.constant 0 : index
    %50 = vector.load %arg2[%c0_17, %49, %c0_18, %c0_19] : memref<1x4x8x128xf32, #tpu.memory_space<vmem>>, vector<1x1x8x128xf32>
    %51 = vector.shape_cast %50 : vector<1x1x8x128xf32> to vector<8x128xf32>
    %cst_20 = arith.constant dense<0.000000e+00> : vector<8x128xf32>
    %52 = tpu.matmul %48, %4, %cst_20 {dimension_numbers = #tpu.dot_dimension_numbers<[1], [0], [0], [1], [0, 0, 1, 1], [], []>} : vector<8x32xf32>, vector<32x128xf32>, vector<8x128xf32> -> vector<8x128xf32>
    %53 = arith.addf %51, %52 : vector<8x128xf32>
    %54 = vector.extract_strided_slice %53 {offsets = [0, 0], sizes = [8, 32], strides = [1, 1]} : vector<8x128xf32> to vector<8x32xf32>
    %55 = math.tanh %54 : vector<8x32xf32>
    %56 = vector.extract_strided_slice %53 {offsets = [0, 32], sizes = [8, 96], strides = [1, 1]} : vector<8x128xf32> to vector<8x96xf32>
    %57 = arith.negf %56 : vector<8x96xf32>
    %58 = math.exp %57 : vector<8x96xf32>
    %cst_21 = arith.constant 1.000000e+00 : f32
    %59 = vector.broadcast %cst_21 : f32 to vector<8x96xf32>
    %60 = arith.addf %59, %58 : vector<8x96xf32>
    %61 = arith.divf %59, %60 : vector<8x96xf32>
    %62 = vector.extract_strided_slice %61 {offsets = [0, 0], sizes = [8, 32], strides = [1, 1]} : vector<8x96xf32> to vector<8x32xf32>
    %63 = arith.mulf %55, %62 : vector<8x32xf32>
    %64 = vector.extract_strided_slice %61 {offsets = [0, 32], sizes = [8, 32], strides = [1, 1]} : vector<8x96xf32> to vector<8x32xf32>
    %65 = arith.mulf %45, %64 : vector<8x32xf32>
    %66 = arith.addf %63, %65 : vector<8x32xf32>
    %67 = math.tanh %66 : vector<8x32xf32>
    %68 = vector.extract_strided_slice %61 {offsets = [0, 64], sizes = [8, 32], strides = [1, 1]} : vector<8x96xf32> to vector<8x32xf32>
    %69 = arith.mulf %67, %68 : vector<8x32xf32>
    %c3_i32 = arith.constant 3 : i32
    %c0_22 = arith.constant 0 : index
    %70 = arith.index_cast %c3_i32 : i32 to index
    %c0_23 = arith.constant 0 : index
    %c0_24 = arith.constant 0 : index
    %71 = vector.load %arg2[%c0_22, %70, %c0_23, %c0_24] : memref<1x4x8x128xf32, #tpu.memory_space<vmem>>, vector<1x1x8x128xf32>
    %72 = vector.shape_cast %71 : vector<1x1x8x128xf32> to vector<8x128xf32>
    %cst_25 = arith.constant dense<0.000000e+00> : vector<8x128xf32>
    %73 = tpu.matmul %69, %4, %cst_25 {dimension_numbers = #tpu.dot_dimension_numbers<[1], [0], [0], [1], [0, 0, 1, 1], [], []>} : vector<8x32xf32>, vector<32x128xf32>, vector<8x128xf32> -> vector<8x128xf32>
    %74 = arith.addf %72, %73 : vector<8x128xf32>
    %75 = vector.extract_strided_slice %74 {offsets = [0, 0], sizes = [8, 32], strides = [1, 1]} : vector<8x128xf32> to vector<8x32xf32>
    %76 = math.tanh %75 : vector<8x32xf32>
    %77 = vector.extract_strided_slice %74 {offsets = [0, 32], sizes = [8, 96], strides = [1, 1]} : vector<8x128xf32> to vector<8x96xf32>
    %78 = arith.negf %77 : vector<8x96xf32>
    %79 = math.exp %78 : vector<8x96xf32>
    %cst_26 = arith.constant 1.000000e+00 : f32
    %80 = vector.broadcast %cst_26 : f32 to vector<8x96xf32>
    %81 = arith.addf %80, %79 : vector<8x96xf32>
    %82 = arith.divf %80, %81 : vector<8x96xf32>
    %83 = vector.extract_strided_slice %82 {offsets = [0, 0], sizes = [8, 32], strides = [1, 1]} : vector<8x96xf32> to vector<8x32xf32>
    %84 = arith.mulf %76, %83 : vector<8x32xf32>
    %85 = vector.extract_strided_slice %82 {offsets = [0, 32], sizes = [8, 32], strides = [1, 1]} : vector<8x96xf32> to vector<8x32xf32>
    %86 = arith.mulf %66, %85 : vector<8x32xf32>
    %87 = arith.addf %84, %86 : vector<8x32xf32>
    %88 = math.tanh %87 : vector<8x32xf32>
    %89 = vector.extract_strided_slice %82 {offsets = [0, 64], sizes = [8, 32], strides = [1, 1]} : vector<8x96xf32> to vector<8x32xf32>
    %90 = arith.mulf %88, %89 : vector<8x32xf32>
    %c4_i32 = arith.constant 4 : i32
    %c0_27 = arith.constant 0 : index
    %c0_28 = arith.constant 0 : index
    %91 = vector.load %arg5[%c0_27, %c0_28] : memref<8x32xf32, #tpu.memory_space<vmem>>, vector<8x32xf32>
    tpu.vector_store %arg5[%c0_27, %c0_28], %90 {strides = array<i32>} : memref<8x32xf32, #tpu.memory_space<vmem>>, vector<8x32xf32>,
    %c0_29 = arith.constant 0 : index
    %c0_30 = arith.constant 0 : index
    %92 = vector.load %arg6[%c0_29, %c0_30] : memref<8x32xf32, #tpu.memory_space<vmem>>, vector<8x32xf32>
    tpu.vector_store %arg6[%c0_29, %c0_30], %87 {strides = array<i32>} : memref<8x32xf32, #tpu.memory_space<vmem>>, vector<8x32xf32>,
    %c0_31 = arith.constant 0 : index
    %c0_32 = arith.constant 0 : index
    %c0_33 = arith.constant 0 : index
    %93 = vector.load %arg4[%c0_31, %c0_32, %c0_33] : memref<1x8x32xf32, #tpu.memory_space<vmem>>, vector<1x8x32xf32>
    %94 = vector.shape_cast %93 : vector<1x8x32xf32> to vector<8x32xf32>
    %95 = vector.shape_cast %90 : vector<8x32xf32> to vector<1x8x32xf32>
    tpu.vector_store %arg4[%c0_31, %c0_32, %c0_33], %95 {strides = array<i32>} : memref<1x8x32xf32, #tpu.memory_space<vmem>>, vector<1x8x32xf32>,
    return
  }
  func.func @transform_0(%arg0: i32, %arg1: i32) -> (i32, i32, i32, i32) {
    %c0_i32 = arith.constant 0 : i32
    %c0_i32_0 = arith.constant 0 : i32
    %c0_i32_1 = arith.constant 0 : i32
    return %arg0, %arg1, %c0_i32, %c0_i32_0 : i32, i32, i32, i32
  }
  func.func @transform_1(%arg0: i32, %arg1: i32) -> (i32, i32, i32) {
    %c0_i32 = arith.constant 0 : i32
    %c0_i32_0 = arith.constant 0 : i32
    %c0_i32_1 = arith.constant 0 : i32
    return %arg0, %c0_i32, %c0_i32_0 : i32, i32, i32
  }
  func.func @transform_2(%arg0: i32, %arg1: i32) -> (i32, i32, i32) {
    %c0_i32 = arith.constant 0 : i32
    %c0_i32_0 = arith.constant 0 : i32
    %c0_i32_1 = arith.constant 0 : i32
    return %arg0, %c0_i32, %c0_i32_0 : i32, i32, i32
  }
}

</mosaic_0001>

<bundles_post_ra>
// kernel: tpu_custom_call.1
= control target key start
LH: loop header
LB: loop body
LE: loop exit
PB: predicated region body
PF: predicated region fallthrough
CT: control target
= control target key end

     0   :  { %s1581_s0 = inlined_call_operand.hbm [shape: f32[2,8,8,128], index: 0, kind: input, shape index: {}]   ;;  %s1582_s1 = inlined_call_operand.hbm [shape: f32[2,32,128], index: 1, kind: input, shape index: {}]   ;;  %s1583_s2 = inlined_call_operand.hbm [shape: f32[2,8,32], index: 2, kind: output, shape index: {}]  }
   0x1   :  { %1593 = sst [smem:[#allocation14_spill]] %s1581_s0 }
   0x2   :  { %7 = vsyncpa [#allocation5], 0 }
   0x3   :  { %9 = vsyncpa [#allocation5 + $0x1], 0 }
   0x4   :  { %10 = vsyncpa [#allocation8], 0 }
   0x5   :  { %12 = vsyncpa [#allocation8 + $0x1], 0 }
   0x6   :  { %13 = vsyncpa [#allocation6], 0 }
   0x7   :  { %15 = vsyncpa [#allocation6 + $0x1], 0  ;;  %s1231_s9 = smov 0   ;;  %s1233_s10 = smov 0  }
   0x8   :  { %s1235_s11 = smov 0   ;;  %s1237_s12 = smov 0  }
   0x9   :  { %s1239_s13 = smov 0   ;;  %s1241_s14 = smov 0  }
   0xa   :  { %s1243_s15 = smov 0   ;;  %s1245_s16 = smov 0  }
   0xb   :  { %s1247_s17 = smov 0   ;;  %s1249_s18 = smov 0  }
   0xc   :  { %s1251_s19 = smov 0  }
   0xd LB: > { %s1584_s20 = sadd.s32 4294967295, %s1202_s19   ;;  %s30_s21 = sadd.s32 1, %s1194_s17  ;;  %s1202_s19 = sphi %s1251_s19, %s21_s19   ;;  %s1198_s18 = sphi %s1249_s18, %s1626_s18   ;;  %s1194_s17 = sphi %s1247_s17, %s1625_s17   ;;  %s1190_s16 = sphi %s1245_s16, %s1624_s16   ;;  %s1186_s15 = sphi %s1243_s15, %s1623_s15   ;;  %s1182_s14 = sphi %s1241_s14, %s1622_s14   ;;  %s1178_s13 = sphi %s1239_s13, %s1621_s13   ;;  %s1174_s12 = sphi %s1237_s12, %s1620_s12   ;;  %s1170_s11 = sphi %s1235_s11, %s1619_s11   ;;  %s1166_s10 = sphi %s1233_s10, %s1618_s10   ;;  %s1162_s9 = sphi %s1231_s9, %s1617_s9  }
   0xe   : > { %p31_p0 = scmp.ge.s32.totalorder %s30_s21, 2  ;;  %s33_s22 = sadd.s32 1, %s1198_s18 }
   0xf   : > { %s42_s23 = sadd.s32 1, %s1182_s14  ;;  %p49_p1 = scmp.ne.s32.totalorder %s1182_s14, %s1178_s13 }
  0x10   : > { %s1628_s21 = smov (%p31_p0, %s30_s21), 0  ;;  %s1630_s22 = smov (!%p31_p0, %s33_s22), %s1198_s18 }
  0x11   : > { %s38_s24 = ssub.s32 %s1194_s17, %s1628_s21  ;;  %p1587_p2 = scmp.eq.s32.totalorder %s1202_s19, 0 }
  0x12   : > { %p35_p3 = scmp.ge.s32.totalorder %s1630_s22, 2  ;;  %p55_p4 = scmp.ne.s32.totalorder %s1178_s13, %s1174_s12 }
  0x13   : > { %p1299_p5 = por %p1587_p2, %p49_p1  ;;  %p1305_p6 = scmp.eq.s32.totalorder %s1584_s20, 0 }
  0x14   : > { %s1632_s22 = smov (%p35_p3, %s1630_s22), 0  ;;  %p1586_p8 = scmp.lt.s32.totalorder %s1202_s19, 4 }
  0x15   : > { %1596 = sst [smem:[#allocation13_spill]] %s1632_s22  ;;  %p1313_p7 = por %p1305_p6, %p55_p4 }
  0x16   : > { %s1319_s28 = ssub.s32 %s1198_s18, %s1632_s22  ;;  %s131_s30 = sand.u32 1, %s1182_s14  }
  0x17   : > { %s1597_s27 = scalar_select %p1313_p7, 1, 0 }
  0x18   : > { %s39_s29 = sor.u32 %s38_s24, %s1319_s28  ;;  %s752_s3 = sshll.u32 %s131_s30, 5 }
  0x19   : > { %p40_p10 = scmp.eq.s32.totalorder %s39_s29, 0  ;;  %s753_s5 = sshll.u32 %s1194_s17, 2 }
  0x1a   : > { %s754_s6 = sshll.u32 %s1198_s18, 3  ;;  %s135_s7 = scalar_lea.vmem [#allocation4], %s752_s3 }
  0x1b   : > { %s1326_s4 = scalar_select %p40_p10, %s1182_s14, %s42_s23  }
  0x1c   : > { %s144_s8 = sshll.u32 %s135_s7, 4  ;;  %s141_s12 = sadd.s32 %s754_s6, %s753_s5  ;;  %s1330_s8 = int_to_ptr.vmem [resolvable:$true] %s144_s8 }
  0x1d   : > { %s755_s20 = sshll.u32 %s141_s12, 7  ;;  %p1336_p11 = pnand %p1586_p8, %p1299_p5 }
  0x1e   : > { %s1599_s0 = sld [smem:[#allocation14_spill]]  ;;  %s1345_s3 = scalar_lea.sflag [#allocation5], %s131_s30 }
  0x1f   : > { %p1018_p13 = pneg %p1336_p11 }
  0x24   : > { %s1343_s23 = scalar_lea.hbm %s1599_s0, %s755_s20  ;;  %s1021_s7 = scalar_lea.hbm %s1599_s0, 2048 }
  0x25   : > { %s1016_s5 = scalar_lea.hbm %s1343_s23, 512  ;;  %p1022_p3 = scmp.lt.u32.totalorder %s1343_s23, %s1599_s0 }
  0x26   : > { %p1017_p12 = scmp.ne.s32.totalorder %s1343_s23, %s1016_s5  ;;  %p1023_p4 = scmp.lt.u32.totalorder %s1021_s7, %s1016_s5 }
  0x27   : > { %p1025_p10 = scmp.lt.u32.totalorder %s1016_s5, %s1343_s23 }
  0x28   : > { %p1019_p0 = pnand %p1018_p13, %p1017_p12  ;;  %p1024_p5 = por %p1023_p4, %p1022_p3 }
  0x2a   : > { %p1020_p1 = pneg %p1019_p0  ;;  %p1026_p8 = por %p1025_p10, %p1024_p5 }
  0x2c   : > { %p1027_p2 = pnand %p1026_p8, %p1020_p1 }
  0x2e   : > { %1030 = shalt.err (!%p1027_p2)
}
  0x2f   : > { %s1031_s30 = scalar_lea.vmem %s1330_s8, 512  ;;  %s1204_s24 = smov [#allocation4]  }
  0x30   : > { %p1032_p12 = scmp.ne.s32.totalorder %s1330_s8, %s1031_s30  ;;  %s1036_s29 = sshll.u32 %s1204_s24, 4  ;;  %s1037_s29 = int_to_ptr.vmem [resolvable:$false] %s1036_s29 }
  0x31   : > { %s1038_s25 = scalar_lea.vmem %s1037_s29, 1024  ;;  %p1039_p7 = scmp.lt.s32.totalorder %s1330_s8, %s1037_s29 }
  0x32   : > { %p1034_p0 = pnand %p1032_p12, %p1018_p13  ;;  %p1040_p3 = scmp.lt.s32.totalorder %s1038_s25, %s1031_s30 }
  0x34   : > { %p1035_p9 = pneg %p1034_p0  ;;  %p1041_p4 = por %p1040_p3, %p1039_p7 }
  0x36   : > { %p1042_p5 = pnand %p1041_p4, %p1035_p9 }
  0x38   : > { %1045 = shalt.err (!%p1042_p5)
}
  0x39   : > { %s1589_s5 = smov 128   ;;  %s1590_s6 = smov 8  }
  0x3a   : > { %877 = dma.hbm_to_vmem [thread:$0]  (!%p1336_p11), %s1343_s23, 512, %s1330_s8, %s1345_s3, %s1589_s5, %s1589_s5, %s1590_s6  }
  0x3b   : > { %p759_p2 = scmp.ge.s32.totalorder %s1202_s19, 1  ;;  %p173_p7 = scmp.lt.s32.totalorder %s1202_s19, 5 }
  0x3c   : > { %s749_s20 = sadd.s32 4294967294, %s1202_s19   ;;  %s68_s12 = sadd.s32 1, %s1170_s11 }
  0x3d   : > { %p1378_p8 = pnand %p759_p2, %p173_p7  ;;  %p75_p9 = scmp.ne.s32.totalorder %s1170_s11, %s1166_s10 }
  0x3e   : > { %p1601_p13 = scmp.eq.s32.totalorder %s1319_s28, 0  ;;  %p1602_p1 = scmp.eq.s32.totalorder %s1202_s19, 0 }
  0x3f   : > { %p81_p11 = scmp.ne.s32.totalorder %s1166_s10, %s1162_s9  ;;  %s1604_s8 = sadd.s32 4294967295, %s1202_s19  }
  0x40   : > { %s1389_s30 = scalar_select %p1601_p13, %s1170_s11, %s68_s12  }
  0x41   : > { %p1393_p10 = por %p75_p9, %p1602_p1  ;;  %p105_p12 = scmp.eq.s32.totalorder %s1604_s8, 3 }
  0x42   : > { %p111_p0 = scmp.eq.s32.totalorder %s749_s20, 3  ;;  %p1403_p3 = por %p81_p11, %p1305_p6 }
  0x43   : > { %s154_s3 = sand.u32 1, %s1170_s11   ;;  %p1408_p4 = por %p105_p12, %p75_p9 }
  0x44   : > { %s1605_s23 = scalar_select %p1403_p3, 1, 0 }
  0x45   : > { %s1606_s28 = scalar_select %p1408_p4, 1, 0 }
  0x46   : > { %p1412_p5 = por %p111_p0, %p81_p11  ;;  %s756_s29 = sshll.u32 %s154_s3, 5 }
  0x47   : > { %s779_s25 = sshll.u32 %s1198_s18, 9  ;;  %s158_s26 = scalar_lea.vmem [#allocation7], %s756_s29 }
  0x48   : > { %s1607_s24 = scalar_select %p1412_p5, 1, 0 }
  0x49   : > { %s1420_s20 = scalar_lea.hbm %s1582_s1, %s779_s25  ;;  %s165_s8 = sshll.u32 %s158_s26, 4  ;;  %s1422_s8 = int_to_ptr.vmem [resolvable:$true] %s165_s8 }
  0x4a   : > { %p1608_p6 = scmp.lt.s32.totalorder %s1202_s19, 4  ;;  %s1432_s0 = scalar_lea.sflag [#allocation8], %s154_s3 }
  0x4b   : > { %s1046_s5 = scalar_lea.hbm %s1420_s20, 512  ;;  %s1051_s22 = scalar_lea.hbm %s1582_s1, 1024 }
  0x4c   : > { %p1428_p2 = pnand %p1608_p6, %p1393_p10  ;;  %p1047_p7 = scmp.ne.s32.totalorder %s1420_s20, %s1046_s5 }
  0x4d   : > { %p1052_p10 = scmp.lt.u32.totalorder %s1420_s20, %s1582_s1  ;;  %p1053_p11 = scmp.lt.u32.totalorder %s1051_s22, %s1046_s5 }
  0x4e   : > { %p1048_p9 = pneg %p1428_p2  ;;  %p1055_p0 = scmp.lt.u32.totalorder %s1046_s5, %s1420_s20 }
  0x4f   : > { %p1054_p12 = por %p1053_p11, %p1052_p10 }
  0x50   : > { %p1049_p13 = pnand %p1048_p9, %p1047_p7 }
  0x51   : > { %p1056_p6 = por %p1055_p0, %p1054_p12 }
  0x52   : > { %p1050_p1 = pneg %p1049_p13 }
  0x54   : > { %p1057_p5 = pnand %p1056_p6, %p1050_p1 }
  0x56   : > { %1060 = shalt.err (!%p1057_p5)
}
  0x57   : > { %s1061_s3 = scalar_lea.vmem %s1422_s8, 512  ;;  %s1207_s29 = smov [#allocation7]  }
  0x58   : > { %p1062_p7 = scmp.ne.s32.totalorder %s1422_s8, %s1061_s3  ;;  %s1066_s25 = sshll.u32 %s1207_s29, 4  ;;  %s1067_s25 = int_to_ptr.vmem [resolvable:$false] %s1066_s25 }
  0x59   : > { %s1068_s12 = scalar_lea.vmem %s1067_s25, 1024  ;;  %p1069_p3 = scmp.lt.s32.totalorder %s1422_s8, %s1067_s25 }
  0x5a   : > { %p1064_p13 = pnand %p1062_p7, %p1048_p9  ;;  %p1070_p10 = scmp.lt.s32.totalorder %s1068_s12, %s1061_s3 }
  0x5c   : > { %p1065_p4 = pneg %p1064_p13  ;;  %p1071_p11 = por %p1070_p10, %p1069_p3 }
  0x5e   : > { %p1072_p12 = pnand %p1071_p11, %p1065_p4 }
  0x60   : > { %1075 = shalt.err (!%p1072_p12)
}
  0x61   : > { %s1610_s5 = smov 8   ;;  %s1611_s22 = smov 128  }
  0x62   : > { %880 = dma.hbm_to_vmem [thread:$0]  (!%p1428_p2), %s1420_s20, 512, %s1422_s8, %s1432_s0, %s1611_s22, %s1611_s22, %s1610_s5  }
  0x63   : > { %177 = sbr.rel (%p1378_p8) target bundleno = 1636 (0x664), region = 28  ;;  %s179_s26 = sand.u32 (!%p1378_p8), 1, %s1178_s13  }
  0x64   : > { %s760_s29 = sshll.u32 (!%p1378_p8), %s179_s26, 5  ;;  %s180_s3 = scalar_lea.sflag (!%p1378_p8), [#allocation5], %s179_s26 }
  0x65   : > { %s1466_s25 = scalar_lea.vmem (!%p1378_p8), [#allocation4], %s760_s29  ;;  %p1612_p3 = scmp.ne.s32.totalorder (!%p1378_p8), %s1597_s27, 0 }
  0x6a   : > { %1149 = dma.done.wait (%p1612_p3), %s180_s3, 512  }
  0x6b   : > { %1151 = vsyncadd (%p1612_p3), %s180_s3, 4294966784  ;;  %s1473_s6 = sand.u32 1, %s1166_s10   ;;  %p1613_p8 = scmp.ne.s32.totalorder %s1605_s23, 0 }
  0x6c   : > { %s761_s0 = sshll.u32 %s1473_s6, 5  ;;  %s189_s7 = scalar_lea.sflag [#allocation8], %s1473_s6 }
  0x6d   : > { %s192_s20 = scalar_lea.vmem [#allocation7], %s761_s0 }
  0x6e   : > { %1153 = dma.done.wait (%p1613_p8), %s189_s7, 512  }
  0x6f   : > { %1155 = vsyncadd (%p1613_p8), %s189_s7, 4294966784  ;;  %s762_s8 = sshll.u32 %s1473_s6, 3  ;;  %p763_p4 = scmp.ne.s32.totalorder %s1186_s15, 0 }
  0x70   : > { %s1482_s12 = scalar_lea.vmem [#allocation9], %s762_s8  ;;  %vm223_vm0 = vcmask (!%p763_p4), 261120   ;;  %v1208_v0 = vmov (!%p763_p4), 0.0  }
  0x71   : > { %222 = sbr.rel (%p763_p4) target bundleno = 120 (0x78), region = 40  ;;  %224 = vst.msk [vmem:[#allocation2] sm:$0xff] (!%p763_p4), %vm223_vm0, %v1208_v0  ;;  %225 = vst.msk [vmem:[#allocation3] sm:$0xff] (!%p763_p4), %vm223_vm0, %v1208_v0 }
  0x78 PF: > { %v226_v1 = vld [vmem:[%s192_s20] sm:$0xff]  ;;  %v227_v2 = vld [vmem:[%s192_s20 + $0x8] sm:$0xff]  ;;  %v228_v3 = vld [vmem:[%s192_s20 + $0x10] sm:$0xff]  ;;  %v1209_v4 = vmov 0.0|0.0   ;;  %vm1210_vm1 = vmmov 0   ;;  %v1211_v7 = vmov 0.0  }
  0x79   : > { %844 = vmatprep.subr.bf16.mxu0 %v1209_v4  ;;  %v845_v5 = vpack.c.bf16 %v227_v2, %v226_v1  ;;  %v229_v6 = vld [vmem:[%s192_s20 + $0x18] sm:$0xff]  ;;  %808 = vmatprep.mubr.msk.f32.mxu0 %vm1210_vm1, %v1211_v7  ;;  %v230_v9 = vld [vmem:[#allocation2] sm:$0xff]  ;;  %vm233_vm2 = vcmask 261120   ;;  %v232_v10 = vld [vmem:[%s1466_s25] sm:$0xff]  ;;  %s1212_s15 = smov 32   ;;  %s1213_s27 = smov 96  }
  0x7a   : > { %850 = vmatprep.subr.bf16.mxu1 %v1209_v4  ;;  %819 = vmatprep.mubr.msk.f32.mxu1 %vm1210_vm1, %v1211_v7  ;;  %v848_v8 = vpack.c.bf16 %v229_v6, %v228_v3  ;;  %s1214_s23 = smov 64   ;;  %v231_v19 = vld [vmem:[#allocation3] sm:$0xff]  ;;  %v766_v28 = vld [vmem:[%s1466_s25 + $0x8] sm:$0xff]  ;;  %v769_v45 = vld [vmem:[%s1466_s25 + $0x10] sm:$0xff]  ;;  %s776_s5 = sshll.u32 %s1190_s16, 7 }
  0x7b   : > { %846 = vmatpush3.bf16.msra.mxu0 %v845_v5  ;;  %852 = vmatpush3.bf16.msra.mxu1 %v845_v5  ;;  %v772_v62 = vld [vmem:[%s1466_s25 + $0x18] sm:$0xff]  ;;  %s641_s22 = sshll.u32 %s1482_s12, 4  ;;  %s1515_s3 = scalar_lea.hbm %s1583_s2, %s776_s5  ;;  %s1517_s22 = int_to_ptr.vmem [resolvable:$true] %s641_s22 }
  0x7c   : > { %847 = vmatprep.subr.bf16.mxu0 %v1209_v4  ;;  %853 = vmatprep.subr.bf16.mxu1 %v1209_v4  ;;  %s628_s25 = scalar_lea.sflag [#allocation6], %s1473_s6  ;;  %s1076_s16 = scalar_lea.vmem %s1517_s22, 128 }
  0x7d   : > { %p1077_p5 = scmp.ne.s32.totalorder %s1517_s22, %s1076_s16  ;;  %p1614_p2 = scmp.ne.s32.totalorder %s1606_s28, 0 }
  0x7e   : > { %s1215_s0 = smov [#allocation9]  }
  0x7f   : > { %849 = vmatpush3.bf16.msra.mxu0 %v848_v8  ;;  %855 = vmatpush3.bf16.msra.mxu1 %v848_v8  ;;  %p1078_p9 = pnand %p1077_p5, %p1614_p2  ;;  %s1080_s7 = sshll.u32 %s1215_s0, 4  ;;  %s1081_s7 = int_to_ptr.vmem [resolvable:$false] %s1080_s7 }
  0x80   : > { %856 = vmatprep.subr.bf16.mxu0 %v1209_v4  ;;  %862 = vmatprep.subr.bf16.mxu1 %v1209_v4  ;;  %s1082_s20 = scalar_lea.vmem %s1081_s7, 256  ;;  %p1083_p0 = scmp.lt.s32.totalorder %s1517_s22, %s1081_s7 }
  0x81   : > { %p1079_p1 = pneg %p1078_p9  ;;  %p1084_p6 = scmp.lt.s32.totalorder %s1082_s20, %s1076_s16 }
  0x82   : > { %809 = vmatmul.mubr.msk.f32.vlgmr.msra.gmra.mrb[0].mxu0 %vm233_vm2, %v230_v9 }
  0x83   : > { %858 = vmatpush3.bf16.msra.mxu0 %v845_v5  ;;  %830 = vmatprep.mubr.msk.f32.mxu0 %vm1210_vm1, %v1211_v7  ;;  %p1085_p7 = por %p1084_p6, %p1083_p0 }
  0x84   : > { %859 = vmatprep.subr.bf16.mxu0 %v1209_v4 }
  0x85   : > { %p1086_p13 = pnand %p1085_p7, %p1079_p1 }
  0x87   : > { %861 = vmatpush3.bf16.msra.mxu0 %v848_v8 }
 0x155   : > { %v303_v11 = vpop.f32.mrb[0].mxu0 }
 0x156   : > { %v307_v12 = vadd.f32 %v303_v11, %v232_v10  ;;  %v810_v13 = vpop.f32.mrb[1].mxu0 }
 0x158   : > { %v765_v14 = vmul.f32 -1.442695, %v307_v12 }
 0x15a   : > { %984 = vpow2.f32 %v765_v14 }
 0x164   : > { %v985_v15 = vpop.eup %984 }
 0x165   : > { %v312_v16 = vadd.f32 1.0, %v985_v15 }
 0x167   : > { %986 = vrcp.f32 %v312_v16 }
 0x168   : > { %988 = vtanh.f32 %v307_v12 }
 0x171   : > { %v987_v17 = vpop.eup %986 }
 0x172   : > { %326 = vrot.lane.b32.xlu1 %v987_v17, %s1212_s15  ;;  %316 = vrot.lane.b32.xlu0 %v987_v17, %s1213_s27  ;;  %v989_v20 = vpop.eup %988 }
 0x176   : > { %320 = vrot.lane.b32.xlu0 %v987_v17, %s1214_s23 }
 0x1e4   : > { %v317_v18 = vpop.permute.xlu0 %316  ;;  %v327_v26 = vpop.permute.xlu1 %326 }
 0x1e5   : > { %v319_v22 = vmul.f32 %v989_v20, %v317_v18 }
 0x1e8   : > { %v321_v21 = vpop.permute.xlu0 %320 }
 0x1e9   : > { %v323_v23 = vmul.f32 %v321_v21, %v231_v19 }
 0x1eb   : > { %v324_v24 = vadd.f32 %v323_v23, %v319_v22 }
 0x1ed   : > { %990 = vtanh.f32 %v324_v24 }
 0x1f7   : > { %v991_v25 = vpop.eup %990 }
 0x1f8   : > { %v329_v27 = vmul.f32 %v991_v25, %v327_v26 }
 0x1fa   : > { %820 = vmatmul.mubr.msk.f32.vlgmr.msra.gmra.mrb[0].mxu1 %vm233_vm2, %v329_v27 }
 0x1fb   : > { %864 = vmatpush3.bf16.msra.mxu1 %v845_v5  ;;  %841 = vmatprep.mubr.msk.f32.mxu1 %vm1210_vm1, %v1211_v7 }
 0x1fc   : > { %865 = vmatprep.subr.bf16.mxu1 %v1209_v4 }
 0x1ff   : > { %867 = vmatpush3.bf16.msra.mxu1 %v848_v8 }
 0x2cd   : > { %v401_v29 = vpop.f32.mrb[0].mxu1 }
 0x2ce   : > { %v405_v30 = vadd.f32 %v766_v28, %v401_v29  ;;  %v821_v31 = vpop.f32.mrb[1].mxu1 }
 0x2d0   : > { %v768_v32 = vmul.f32 -1.442695, %v405_v30 }
 0x2d2   : > { %992 = vpow2.f32 %v768_v32 }
 0x2dc   : > { %v993_v33 = vpop.eup %992 }
 0x2dd   : > { %v410_v34 = vadd.f32 1.0, %v993_v33 }
 0x2df   : > { %994 = vrcp.f32 %v410_v34 }
 0x2e0   : > { %996 = vtanh.f32 %v405_v30 }
 0x2e9   : > { %v995_v35 = vpop.eup %994 }
 0x2ea   : > { %418 = vrot.lane.b32.xlu0 %v995_v35, %s1214_s23  ;;  %414 = vrot.lane.b32.xlu1 %v995_v35, %s1213_s27  ;;  %v997_v36 = vpop.eup %996 }
 0x2ee   : > { %424 = vrot.lane.b32.xlu1 %v995_v35, %s1212_s15 }
 0x35c   : > { %v419_v37 = vpop.permute.xlu0 %418  ;;  %v415_v38 = vpop.permute.xlu1 %414 }
 0x35d   : > { %v421_v39 = vmul.f32 %v419_v37, %v324_v24  ;;  %v417_v40 = vmul.f32 %v997_v36, %v415_v38 }
 0x35f   : > { %v422_v41 = vadd.f32 %v421_v39, %v417_v40 }
 0x360   : > { %v425_v43 = vpop.permute.xlu1 %424 }
 0x361   : > { %998 = vtanh.f32 %v422_v41 }
 0x36b   : > { %v999_v42 = vpop.eup %998 }
 0x36c   : > { %v427_v44 = vmul.f32 %v999_v42, %v425_v43 }
 0x36e   : > { %831 = vmatmul.mubr.msk.f32.vlgmr.msra.gmra.mrb[2].mxu0 %vm233_vm2, %v427_v44 }
 0x441   : > { %v499_v46 = vpop.f32.mrb[2].mxu0 }
 0x442   : > { %v503_v47 = vadd.f32 %v769_v45, %v499_v46  ;;  %v832_v48 = vpop.f32.mrb[3].mxu0 }
 0x444   : > { %v771_v49 = vmul.f32 -1.442695, %v503_v47 }
 0x446   : > { %1000 = vpow2.f32 %v771_v49 }
 0x450   : > { %v1001_v50 = vpop.eup %1000 }
 0x451   : > { %v508_v51 = vadd.f32 1.0, %v1001_v50 }
 0x453   : > { %1002 = vrcp.f32 %v508_v51 }
 0x454   : > { %1004 = vtanh.f32 %v503_v47 }
 0x45d   : > { %v1003_v52 = vpop.eup %1002 }
 0x45e   : > { %516 = vrot.lane.b32.xlu1 %v1003_v52, %s1214_s23  ;;  %512 = vrot.lane.b32.xlu0 %v1003_v52, %s1213_s27  ;;  %v1005_v53 = vpop.eup %1004 }
 0x462   : > { %522 = vrot.lane.b32.xlu0 %v1003_v52, %s1212_s15 }
 0x4d0   : > { %v517_v54 = vpop.permute.xlu1 %516  ;;  %v513_v55 = vpop.permute.xlu0 %512 }
 0x4d1   : > { %v519_v56 = vmul.f32 %v517_v54, %v422_v41  ;;  %v515_v57 = vmul.f32 %v1005_v53, %v513_v55 }
 0x4d3   : > { %v520_v58 = vadd.f32 %v519_v56, %v515_v57 }
 0x4d4   : > { %v523_v60 = vpop.permute.xlu0 %522 }
 0x4d5   : > { %1006 = vtanh.f32 %v520_v58 }
 0x4df   : > { %v1007_v59 = vpop.eup %1006 }
 0x4e0   : > { %v525_v61 = vmul.f32 %v1007_v59, %v523_v60 }
 0x4e2   : > { %842 = vmatmul.mubr.msk.f32.vlgmr.msra.gmra.mrb[2].mxu1 %vm233_vm2, %v525_v61 }
 0x5b5   : > { %v597_v63 = vpop.f32.mrb[2].mxu1 }
 0x5b6   : > { %v601_v0 = vadd.f32 %v772_v62, %v597_v63  ;;  %v843_v1 = vpop.f32.mrb[3].mxu1 }
 0x5b8   : > { %v774_v2 = vmul.f32 -1.442695, %v601_v0 }
 0x5ba   : > { %1008 = vpow2.f32 %v774_v2 }
 0x5c4   : > { %v1009_v3 = vpop.eup %1008 }
 0x5c5   : > { %v606_v4 = vadd.f32 1.0, %v1009_v3 }
 0x5c7   : > { %1010 = vrcp.f32 %v606_v4 }
 0x5c8   : > { %1012 = vtanh.f32 %v601_v0 }
 0x5d1   : > { %v1011_v5 = vpop.eup %1010 }
 0x5d2   : > { %614 = vrot.lane.b32.xlu0 %v1011_v5, %s1214_s23  ;;  %610 = vrot.lane.b32.xlu1 %v1011_v5, %s1213_s27  ;;  %v1013_v6 = vpop.eup %1012 }
 0x5d6   : > { %620 = vrot.lane.b32.xlu1 %v1011_v5, %s1212_s15 }
 0x644   : > { %v615_v7 = vpop.permute.xlu0 %614  ;;  %v611_v8 = vpop.permute.xlu1 %610 }
 0x645   : > { %v617_v9 = vmul.f32 %v615_v7, %v520_v58  ;;  %v613_v10 = vmul.f32 %v1013_v6, %v611_v8 }
 0x647   : > { %v618_v11 = vadd.f32 %v617_v9, %v613_v10 }
 0x648   : > { %v621_v13 = vpop.permute.xlu1 %620 }
 0x649   : > { %1014 = vtanh.f32 %v618_v11  ;;  %625 = vst.msk [vmem:[#allocation3] sm:$0xff] %vm233_vm2, %v618_v11 }
 0x653   : > { %v1015_v12 = vpop.eup %1014 }
 0x654   : > { %v623_v14 = vmul.f32 %v1015_v12, %v621_v13 }
 0x656   : > { %624 = vst.msk [vmem:[#allocation2] sm:$0xff] %vm233_vm2, %v623_v14  ;;  %626 = vst.msk [vmem:[%s1482_s12] sm:$0xff] %vm233_vm2, %v623_v14 }
 0x657   : > { %1089 = shalt.err (!%p1086_p13)
}
 0x658   : > { %s1090_s6 = scalar_lea.hbm %s1515_s3, 128  ;;  %s1094_s15 = scalar_lea.hbm %s1583_s2, 256 }
 0x659   : > { %p1091_p10 = scmp.ne.s32.totalorder %s1515_s3, %s1090_s6  ;;  %p1095_p3 = scmp.lt.u32.totalorder %s1515_s3, %s1583_s2 }
 0x65a   : > { %p1096_p8 = scmp.lt.u32.totalorder %s1094_s15, %s1090_s6  ;;  %p1098_p5 = scmp.lt.u32.totalorder %s1090_s6, %s1515_s3 }
 0x65b   : > { %p1092_p11 = pnand %p1091_p10, %p1614_p2 }
 0x65c   : > { %p1097_p4 = por %p1096_p8, %p1095_p3 }
 0x65d   : > { %p1093_p12 = pneg %p1092_p11 }
 0x65e   : > { %p1099_p9 = por %p1098_p5, %p1097_p4 }
 0x660   : > { %p1100_p1 = pnand %p1099_p9, %p1093_p12 }
 0x662   : > { %1103 = shalt.err (!%p1100_p1)
}
 0x663   : > { %872 = dma.vmem_to_hbm [thread:$0]  (%p1614_p2), %s1517_s22, 128, %s1515_s3, %s628_s25  }
 0x664 PF: > { %p886_p0 = scmp.ge.s32.totalorder %s1202_s19, 2  ;;  %s653_s5 = sand.u32 1, %s1162_s9  }
 0x665   : > { %p1615_p6 = scmp.ne.s32.totalorder %s1607_s24, 0  ;;  %s654_s26 = scalar_lea.sflag [#allocation6], %s653_s5 }
 0x667   : > { %p882_p7 = pnand %p886_p0, %p1615_p6 }
 0x669   : > { %1157 = dma.done.wait (!%p882_p7), %s654_s26, 128  }
 0x66a   : > { %1159 = vsyncadd (!%p882_p7), %s654_s26, 4294967168  ;;  %s21_s19 = sadd.s32 1, %s1202_s19   ;;  %s1616_s28 = sld [smem:[#allocation13_spill]] }
 0x66b   : > { %p18_p13 = scmp.ge.s32.totalorder %s21_s19, 6   ;;  %s1617_s9 = smov %s1166_s10 }
 0x66c   : > { %s1618_s10 = smov %s1170_s11  ;;  %s1619_s11 = smov %s1389_s30 }
 0x66d   : > { %s1620_s12 = smov %s1178_s13  ;;  %s1621_s13 = smov %s1182_s14 }
 0x66e   : > { %s1622_s14 = smov %s1326_s4  ;;  %s1623_s15 = smov %s1194_s17 }
 0x66f   : > { %s1624_s16 = smov %s1198_s18  ;;  %s1625_s17 = smov %s1628_s21 }
 0x670   : > { %s1626_s18 = smov %s1616_s28  ;;  %20 = sbr.rel (!%p18_p13) target bundleno = 13 (0xd), region = 93 }
 0x677   :  { %659 = vsyncpa [#allocation5], 1 }
 0x678   :  { %661 = vsyncpa [#allocation5 + $0x1], 1 }
 0x679   :  { %662 = vsyncpa [#allocation8], 1 }
 0x67a   :  { %664 = vsyncpa [#allocation8 + $0x1], 1 }
 0x67b   :  { %665 = vsyncpa [#allocation6], 1 }
 0x67c   :  { %667 = vsyncpa [#allocation6 + $0x1], 1 }

</bundles_post_ra>
